<compile_context>
chip_gen: v5e
topology: v5e:2x2
jax: 0.10.0
libtpu: 0.0.40
codegen_flags: <defaults>
</compile_context>

<pallas_src>
import functools

import jax
import jax.numpy as jnp
from jax import lax
from jax.experimental import pallas as pl
from jax.experimental.pallas import tpu as pltpu

LANE = 128  # uniform lane-dense padding for activations, weight blocks and vector rows


# ---------------------------------------------------------------------------
# shared math (pure-JAX reference)
# ---------------------------------------------------------------------------
def _layernorm(y, gamma, beta, eps=1e-5):
    mean = jnp.mean(y, axis=-1, keepdims=True)
    var = jnp.mean((y - mean) ** 2, axis=-1, keepdims=True)
    return (y - mean) * lax.rsqrt(var + eps) * gamma + beta


def _leaky_relu(y, slope=0.1):
    return jnp.where(y >= 0, y, slope * y)


# ---------------------------------------------------------------------------
# fused Pallas kernel
# ---------------------------------------------------------------------------
def ae_fused_kernel(x_ref, w_ref, v_ref, o_ref, *, dims, num_attn_layers):
    """x_ref: (TB, 128) f32 (zero-padded past pose_dim)
       w_ref: (n_mats, 128, 128) bf16 weight slab, (in, out) layout, zero-padded
       v_ref: (n_vecs, 128) f32 slab of biases / gammas / betas, zero-padded
       o_ref: (TB, 128) f32 output slab (valid in [:, :pose_dim])"""
    pose_dim, h0, h1, lat = dims

    w_idx = iter(range(w_ref.shape[0]))
    v_idx = iter(range(v_ref.shape[0]))

    def next_w():
        return w_ref[next(w_idx)]                      # (128, 128) bf16

    def next_v():
        i = next(v_idx)
        return v_ref[i:i + 1, :]                       # (1, 128) f32

    def mm(a):
        # y = a @ W + b ; bf16 MXU matmul, f32 accumulation, full 128-lane result.
        w = next_w()
        b = next_v()
        return jnp.dot(a.astype(jnp.bfloat16), w, preferred_element_type=jnp.float32) + b

    def ln(y, d):
        # LayerNorm over the first `d` (valid) lanes; padded lanes stay exactly zero
        # because gamma/beta are zero-padded.
        g = next_v()
        be = next_v()
        inv_d = 1.0 / d
        mean = jnp.sum(y, axis=-1, keepdims=True) * inv_d        # padded lanes are zero
        mask = lax.broadcasted_iota(jnp.int32, y.shape, 1) < d
        cent = jnp.where(mask, y - mean, 0.0)
        var = jnp.sum(cent * cent, axis=-1, keepdims=True) * inv_d
        return cent * lax.rsqrt(var + 1e-5) * g + be

    def lrelu(y):
        return jnp.where(y >= 0, y, 0.1 * y)

    x = x_ref[...]                                     # (TB, 128) f32

    # ---- encoder (Dropout == identity in eval mode) ----
    h = lrelu(ln(mm(x), h0))
    h = lrelu(ln(mm(h), h1))
    z = mm(h)                                          # latent; unsqueeze(1) folded away

    # ---- stacked self-attention, seq_len == 1, folded to one matmul per layer ----
    # softmax over one key == 1  =>  attn == V ; (V @ Wo + bo) + z == z @ (Wv^T Wo^T + I) + b_fold
    for _ in range(num_attn_layers):
        z = ln(mm(z), lat)

    # ---- decoder + residual to the AE input ----
    h = lrelu(ln(mm(z), h1))
    h = lrelu(ln(mm(h), h0))
    o_ref[...] = mm(h) + x                             # full-lane (TB, 128) unmasked store


# ---------------------------------------------------------------------------
# host-side wrapper
# ---------------------------------------------------------------------------
def ae_forward(prepared, x, *, dims, num_attn_layers=2, tb=256, lane=LANE):
    w_slab, v_slab = prepared
    B, pose_dim = x.shape

    # Row-block the batch.  TB=256 fills the v6e/v7x MXU M dim (multiple of 128 for v5e);
    # clamp to the 8-aligned batch for tiny inputs so the demo stays a single step.
    tb = min(tb, pl.cdiv(B, 8) * 8)
    b_pad = pl.cdiv(B, tb) * tb
    x_pad = jnp.pad(x, ((0, b_pad - B), (0, lane - pose_dim)))   # lane-dense, zero-padded

    n_mats = w_slab.shape[0]
    n_ln = 2 + num_attn_layers + 2
    cost = pl.CostEstimate(
        flops=2 * b_pad * lane * lane * n_mats,
        transcendentals=b_pad * n_ln,
        bytes_accessed=w_slab.size * 2 + v_slab.size * 4 + 2 * b_pad * lane * 4,
    )

    out_pad = pl.pallas_call(
        functools.partial(ae_fused_kernel, dims=dims, num_attn_layers=num_attn_layers),
        out_shape=jax.ShapeDtypeStruct((b_pad, lane), jnp.float32),
        grid=(b_pad // tb,),
        in_specs=[
            pl.BlockSpec((tb, lane), lambda i: (i, 0)),                 # x row block (pipelined)
            pl.BlockSpec(w_slab.shape, lambda i: (0, 0, 0)),            # weight slab, resident
            pl.BlockSpec(v_slab.shape, lambda i: (0, 0)),               # bias/LN slab, resident
        ],
        out_specs=pl.BlockSpec((tb, lane), lambda i: (i, 0)),
        compiler_params=pltpu.CompilerParams(dimension_semantics=("parallel",)),
        cost_estimate=cost,
    )(x_pad, w_slab, v_slab)
    return out_pad[:B, :pose_dim]


# ---------------------------------------------------------------------------
# parameters (deterministic synthetic init, PyTorch weight layouts) + host prep
# ---------------------------------------------------------------------------
def _init_linear(key, d_in, d_out):
    k1, k2 = jax.random.split(key)
    w = jax.random.normal(k1, (d_out, d_in), jnp.float32) / jnp.sqrt(jnp.float32(d_in))
    b = 0.01 * jax.random.normal(k2, (1, d_out), jnp.float32)
    return w, b


def _init_ln(d):
    return jnp.ones((1, d), jnp.float32), jnp.zeros((1, d), jnp.float32)


def init_params(key, pose_dim, hidden_dims, latent_dim, num_attn_layers=2):
    keys = iter(jax.random.split(key, 16))
    p = {}
    p["enc0"] = (*_init_linear(next(keys), pose_dim, hidden_dims[0]), *_init_ln(hidden_dims[0]))
    p["enc1"] = (*_init_linear(next(keys), hidden_dims[0], hidden_dims[1]), *_init_ln(hidden_dims[1]))
    p["enc2"] = _init_linear(next(keys), hidden_dims[1], latent_dim)
    attn = []
    for _ in range(num_attn_layers):
        kq, ko = jax.random.split(next(keys))
        wqkv = jax.random.normal(kq, (3 * latent_dim, latent_dim), jnp.float32) / jnp.sqrt(
            jnp.float32(latent_dim))
        bqkv = jnp.zeros((1, 3 * latent_dim), jnp.float32)
        wo = jax.random.normal(ko, (latent_dim, latent_dim), jnp.float32) / jnp.sqrt(
            jnp.float32(latent_dim))
        bo = jnp.zeros((1, latent_dim), jnp.float32)
        g, be = _init_ln(latent_dim)
        attn.append((wqkv, bqkv, wo, bo, g, be))
    p["attn"] = attn
    p["dec0"] = (*_init_linear(next(keys), latent_dim, hidden_dims[1]), *_init_ln(hidden_dims[1]))
    p["dec1"] = (*_init_linear(next(keys), hidden_dims[1], hidden_dims[0]), *_init_ln(hidden_dims[0]))
    p["dec2"] = _init_linear(next(keys), hidden_dims[0], pose_dim)
    return p


def prepare_params(params, lane=LANE):
    """One-time host prep: transpose to (in, out), fold each seq_len==1 attention block to a single
    (W, b) in f32, pack all weights into one (n_mats, 128, 128) bf16 slab and all biases/gammas/betas
    into one (n_vecs, 128) f32 slab (zero-padded)."""
    def pad_w(w_in_out):                         # (K, N) f32, (in, out) -> (128, 128) bf16
        K, N = w_in_out.shape
        blk = jnp.zeros((lane, lane), jnp.float32).at[:K, :N].set(w_in_out)
        return blk.astype(jnp.bfloat16)

    def pad_v(v):                                # (1, d) / (d,) f32 -> (128,) f32
        v = jnp.reshape(v, (-1,))
        return jnp.zeros((lane,), jnp.float32).at[:v.shape[0]].set(v)

    w_blocks, v_rows = [], []

    for name in ("enc0", "enc1"):
        w, b, g, be = params[name]
        w_blocks.append(pad_w(w.T))
        v_rows += [pad_v(b), pad_v(g), pad_v(be)]

    w, b = params["enc2"]
    w_blocks.append(pad_w(w.T))
    v_rows += [pad_v(b)]

    for (wqkv, bqkv, wo, bo, g, be) in params["attn"]:
        E = wo.shape[0]
        wv = wqkv[2 * E:3 * E, :]                # V rows only; Q/K are dead compute at seq_len==1
        bv = bqkv[:, 2 * E:3 * E]
        # fold V-projection, out-projection and the residual into one affine map (in f32)
        w_fold = wv.T @ wo.T + jnp.eye(E, dtype=jnp.float32)
        b_fold = bv @ wo.T + bo
        w_blocks.append(pad_w(w_fold))
        v_rows += [pad_v(b_fold), pad_v(g), pad_v(be)]

    for name in ("dec0", "dec1"):
        w, b, g, be = params[name]
        w_blocks.append(pad_w(w.T))
        v_rows += [pad_v(b), pad_v(g), pad_v(be)]

    w, b = params["dec2"]
    w_blocks.append(pad_w(w.T))
    v_rows += [pad_v(b)]

    return jnp.stack(w_blocks), jnp.stack(v_rows)


# ---------------------------------------------------------------------------
# pure-JAX reference
# ---------------------------------------------------------------------------
def ae_forward_ref(params, x, *, match_kernel_precision=True):
    """Reference forward.  With match_kernel_precision=True it mirrors the kernel's numerics policy
    (f32 attention fold, bf16 matmul operands, f32 accumulation / elementwise)."""
    dt = jnp.bfloat16 if match_kernel_precision else jnp.float32

    def lin(a, w_in_out, b):
        return jnp.dot(a.astype(dt), w_in_out.astype(dt),
                       preferred_element_type=jnp.float32) + b

    def block(a, w, b, g, be):
        return _leaky_relu(_layernorm(lin(a, w.T, b), g, be))

    h = block(x, *params["enc0"])
    h = block(h, *params["enc1"])
    z = lin(h, params["enc2"][0].T, params["enc2"][1])
    for (wqkv, bqkv, wo, bo, g, be) in params["attn"]:
        E = wo.shape[0]
        wv = wqkv[2 * E:3 * E, :]
        bv = bqkv[:, 2 * E:3 * E]
        if match_kernel_precision:
            w_fold = wv.T @ wo.T + jnp.eye(E, dtype=jnp.float32)
            b_fold = bv @ wo.T + bo
            z = _layernorm(lin(z, w_fold, b_fold), g, be)
        else:
            v = z @ wv.T + bv                    # softmax over 1 key == 1 -> attn == V
            a = v @ wo.T + bo
            z = _layernorm(a + z, g, be)
    h = block(z, *params["dec0"])
    h = block(h, *params["dec1"])
    return lin(h, params["dec2"][0].T, params["dec2"][1]) + x


# ---------------------------------------------------------------------------
if __name__ == "__main__":
    relative_input_dim, angle_input_dim = 24, 8
    pose_dim = relative_input_dim + angle_input_dim   # 32
    hidden_dims = [64, 48]
    latent_dim = 16
    num_attn_layers = 2
    batch = 8

    dims = (pose_dim, hidden_dims[0], hidden_dims[1], latent_dim)

    params = init_params(jax.random.PRNGKey(1), pose_dim, hidden_dims, latent_dim,
                         num_attn_layers=num_attn_layers)
    prepared = prepare_params(params)
    x = jax.random.normal(jax.random.PRNGKey(0), (batch, pose_dim), jnp.float32)

    out = jax.block_until_ready(
        ae_forward(prepared, x, dims=dims, num_attn_layers=num_attn_layers))

    assert out.shape == (batch, pose_dim)
    assert bool(jnp.all(jnp.isfinite(out)))

    # tight check vs. a reference with the same precision policy (f32 fold, bf16 matmuls, f32 accum)
    ref = ae_forward_ref(params, x, match_kernel_precision=True)
    assert bool(jnp.allclose(out, ref, atol=1e-2, rtol=1e-2)), float(jnp.max(jnp.abs(out - ref)))
    # sanity check vs. the full-f32 two-matmul-attention reference (original module semantics)
    ref_f32 = ae_forward_ref(params, x, match_kernel_precision=False)
    assert bool(jnp.allclose(out, ref_f32, atol=5e-2, rtol=5e-2)), float(jnp.max(jnp.abs(out - ref_f32)))

    print("KERNEL_OK")
</pallas_src>

<mosaic_0001>
module attributes {stable_mosaic.version = 11 : i64} {
  func.func @ae_fused_kernel(%arg0: i32, %arg1: memref<8x128xf32, #tpu.memory_space<vmem>>, %arg2: memref<8x128x128xbf16, #tpu.memory_space<vmem>>, %arg3: memref<20x128xf32, #tpu.memory_space<vmem>>, %arg4: memref<8x128xf32, #tpu.memory_space<vmem>>) attributes {dimension_semantics = [#tpu.dimension_semantics<parallel>], iteration_bounds = array<i64: 1>, scalar_prefetch = 0 : i64, scratch_operands = 0 : i64, tpu.core_type = #tpu.core_type<tc>, window_params = [{transform_indices = @transform_0, window_bounds = array<i64: 8, 128>}, {pipeline_mode = #tpu.pipeline_mode<synchronous>, transform_indices = @transform_1, window_bounds = array<i64: 8, 128, 128>}, {pipeline_mode = #tpu.pipeline_mode<synchronous>, transform_indices = @transform_2, window_bounds = array<i64: 20, 128>}, {transform_indices = @transform_3, window_bounds = array<i64: 8, 128>}]} {
    %c0 = arith.constant 0 : index
    %c0_0 = arith.constant 0 : index
    %0 = vector.load %arg1[%c0, %c0_0] : memref<8x128xf32, #tpu.memory_space<vmem>>, vector<8x128xf32>
    %c0_1 = arith.constant 0 : index
    %c0_2 = arith.constant 0 : index
    %c0_3 = arith.constant 0 : index
    %1 = vector.load %arg2[%c0_1, %c0_2, %c0_3] : memref<8x128x128xbf16, #tpu.memory_space<vmem>>, vector<1x128x128xbf16>
    %2 = vector.shape_cast %1 : vector<1x128x128xbf16> to vector<128x128xbf16>
    %c0_4 = arith.constant 0 : index
    %c0_5 = arith.constant 0 : index
    %3 = vector.load %arg3[%c0_4, %c0_5] : memref<20x128xf32, #tpu.memory_space<vmem>>, vector<1x128xf32>
    %4 = arith.truncf %0 : vector<8x128xf32> to vector<8x128xbf16>
    %cst = arith.constant dense<0.000000e+00> : vector<8x128xf32>
    %5 = tpu.matmul %4, %2, %cst {dimension_numbers = #tpu.dot_dimension_numbers<[1], [0], [0], [1], [0, 0, 1, 1], [], []>} : vector<8x128xbf16>, vector<128x128xbf16>, vector<8x128xf32> -> vector<8x128xf32>
    %6 = vector.broadcast %3 : vector<1x128xf32> to vector<8x128xf32>
    %7 = arith.addf %5, %6 : vector<8x128xf32>
    %c1 = arith.constant 1 : index
    %c0_6 = arith.constant 0 : index
    %8 = vector.load %arg3[%c1, %c0_6] : memref<20x128xf32, #tpu.memory_space<vmem>>, vector<1x128xf32>
    %c2 = arith.constant 2 : index
    %c0_7 = arith.constant 0 : index
    %9 = vector.load %arg3[%c2, %c0_7] : memref<20x128xf32, #tpu.memory_space<vmem>>, vector<1x128xf32>
    %cst_8 = arith.constant dense<0.000000e+00> : vector<8xf32>
    %10 = vector.multi_reduction <add>, %7, %cst_8 [1] : vector<8x128xf32> to vector<8xf32>
    %11 = vector.shape_cast %10 : vector<8xf32> to vector<8x1xf32>
    %cst_9 = arith.constant 1.562500e-02 : f32
    %12 = vector.broadcast %cst_9 : f32 to vector<8x1xf32>
    %13 = arith.mulf %11, %12 : vector<8x1xf32>
    %14 = tpu.iota {dimensions = array<i32: 1>} : vector<8x128xi32>
    %c64_i32 = arith.constant 64 : i32
    %15 = vector.broadcast %c64_i32 : i32 to vector<8x128xi32>
    %16 = arith.cmpi slt, %14, %15 : vector<8x128xi32>
    %17 = vector.broadcast %13 : vector<8x1xf32> to vector<8x128xf32>
    %18 = arith.subf %7, %17 : vector<8x128xf32>
    %cst_10 = arith.constant 0.000000e+00 : f32
    %19 = vector.broadcast %cst_10 : f32 to vector<8x128xf32>
    %20 = arith.select %16, %18, %19 : vector<8x128xi1>, vector<8x128xf32>
    %21 = arith.mulf %20, %20 : vector<8x128xf32>
    %cst_11 = arith.constant dense<0.000000e+00> : vector<8xf32>
    %22 = vector.multi_reduction <add>, %21, %cst_11 [1] : vector<8x128xf32> to vector<8xf32>
    %23 = vector.shape_cast %22 : vector<8xf32> to vector<8x1xf32>
    %cst_12 = arith.constant 1.562500e-02 : f32
    %24 = vector.broadcast %cst_12 : f32 to vector<8x1xf32>
    %25 = arith.mulf %23, %24 : vector<8x1xf32>
    %cst_13 = arith.constant 9.99999974E-6 : f32
    %26 = vector.broadcast %cst_13 : f32 to vector<8x1xf32>
    %27 = arith.addf %25, %26 : vector<8x1xf32>
    %28 = math.rsqrt %27 : vector<8x1xf32>
    %29 = vector.broadcast %28 : vector<8x1xf32> to vector<8x128xf32>
    %30 = arith.mulf %20, %29 : vector<8x128xf32>
    %31 = vector.broadcast %8 : vector<1x128xf32> to vector<8x128xf32>
    %32 = arith.mulf %30, %31 : vector<8x128xf32>
    %33 = vector.broadcast %9 : vector<1x128xf32> to vector<8x128xf32>
    %34 = arith.addf %32, %33 : vector<8x128xf32>
    %cst_14 = arith.constant 0.000000e+00 : f32
    %35 = vector.broadcast %cst_14 : f32 to vector<8x128xf32>
    %36 = arith.cmpf oge, %34, %35 : vector<8x128xf32>
    %cst_15 = arith.constant 1.000000e-01 : f32
    %37 = vector.broadcast %cst_15 : f32 to vector<8x128xf32>
    %38 = arith.mulf %37, %34 : vector<8x128xf32>
    %39 = arith.select %36, %34, %38 : vector<8x128xi1>, vector<8x128xf32>
    %c1_16 = arith.constant 1 : index
    %c0_17 = arith.constant 0 : index
    %c0_18 = arith.constant 0 : index
    %40 = vector.load %arg2[%c1_16, %c0_17, %c0_18] : memref<8x128x128xbf16, #tpu.memory_space<vmem>>, vector<1x128x128xbf16>
    %41 = vector.shape_cast %40 : vector<1x128x128xbf16> to vector<128x128xbf16>
    %c3 = arith.constant 3 : index
    %c0_19 = arith.constant 0 : index
    %42 = vector.load %arg3[%c3, %c0_19] : memref<20x128xf32, #tpu.memory_space<vmem>>, vector<1x128xf32>
    %43 = arith.truncf %39 : vector<8x128xf32> to vector<8x128xbf16>
    %cst_20 = arith.constant dense<0.000000e+00> : vector<8x128xf32>
    %44 = tpu.matmul %43, %41, %cst_20 {dimension_numbers = #tpu.dot_dimension_numbers<[1], [0], [0], [1], [0, 0, 1, 1], [], []>} : vector<8x128xbf16>, vector<128x128xbf16>, vector<8x128xf32> -> vector<8x128xf32>
    %45 = vector.broadcast %42 : vector<1x128xf32> to vector<8x128xf32>
    %46 = arith.addf %44, %45 : vector<8x128xf32>
    %c4 = arith.constant 4 : index
    %c0_21 = arith.constant 0 : index
    %47 = vector.load %arg3[%c4, %c0_21] : memref<20x128xf32, #tpu.memory_space<vmem>>, vector<1x128xf32>
    %c5 = arith.constant 5 : index
    %c0_22 = arith.constant 0 : index
    %48 = vector.load %arg3[%c5, %c0_22] : memref<20x128xf32, #tpu.memory_space<vmem>>, vector<1x128xf32>
    %cst_23 = arith.constant dense<0.000000e+00> : vector<8xf32>
    %49 = vector.multi_reduction <add>, %46, %cst_23 [1] : vector<8x128xf32> to vector<8xf32>
    %50 = vector.shape_cast %49 : vector<8xf32> to vector<8x1xf32>
    %cst_24 = arith.constant 0.020833334 : f32
    %51 = vector.broadcast %cst_24 : f32 to vector<8x1xf32>
    %52 = arith.mulf %50, %51 : vector<8x1xf32>
    %53 = tpu.iota {dimensions = array<i32: 1>} : vector<8x128xi32>
    %c48_i32 = arith.constant 48 : i32
    %54 = vector.broadcast %c48_i32 : i32 to vector<8x128xi32>
    %55 = arith.cmpi slt, %53, %54 : vector<8x128xi32>
    %56 = vector.broadcast %52 : vector<8x1xf32> to vector<8x128xf32>
    %57 = arith.subf %46, %56 : vector<8x128xf32>
    %cst_25 = arith.constant 0.000000e+00 : f32
    %58 = vector.broadcast %cst_25 : f32 to vector<8x128xf32>
    %59 = arith.select %55, %57, %58 : vector<8x128xi1>, vector<8x128xf32>
    %60 = arith.mulf %59, %59 : vector<8x128xf32>
    %cst_26 = arith.constant dense<0.000000e+00> : vector<8xf32>
    %61 = vector.multi_reduction <add>, %60, %cst_26 [1] : vector<8x128xf32> to vector<8xf32>
    %62 = vector.shape_cast %61 : vector<8xf32> to vector<8x1xf32>
    %cst_27 = arith.constant 0.020833334 : f32
    %63 = vector.broadcast %cst_27 : f32 to vector<8x1xf32>
    %64 = arith.mulf %62, %63 : vector<8x1xf32>
    %cst_28 = arith.constant 9.99999974E-6 : f32
    %65 = vector.broadcast %cst_28 : f32 to vector<8x1xf32>
    %66 = arith.addf %64, %65 : vector<8x1xf32>
    %67 = math.rsqrt %66 : vector<8x1xf32>
    %68 = vector.broadcast %67 : vector<8x1xf32> to vector<8x128xf32>
    %69 = arith.mulf %59, %68 : vector<8x128xf32>
    %70 = vector.broadcast %47 : vector<1x128xf32> to vector<8x128xf32>
    %71 = arith.mulf %69, %70 : vector<8x128xf32>
    %72 = vector.broadcast %48 : vector<1x128xf32> to vector<8x128xf32>
    %73 = arith.addf %71, %72 : vector<8x128xf32>
    %cst_29 = arith.constant 0.000000e+00 : f32
    %74 = vector.broadcast %cst_29 : f32 to vector<8x128xf32>
    %75 = arith.cmpf oge, %73, %74 : vector<8x128xf32>
    %cst_30 = arith.constant 1.000000e-01 : f32
    %76 = vector.broadcast %cst_30 : f32 to vector<8x128xf32>
    %77 = arith.mulf %76, %73 : vector<8x128xf32>
    %78 = arith.select %75, %73, %77 : vector<8x128xi1>, vector<8x128xf32>
    %c2_31 = arith.constant 2 : index
    %c0_32 = arith.constant 0 : index
    %c0_33 = arith.constant 0 : index
    %79 = vector.load %arg2[%c2_31, %c0_32, %c0_33] : memref<8x128x128xbf16, #tpu.memory_space<vmem>>, vector<1x128x128xbf16>
    %80 = vector.shape_cast %79 : vector<1x128x128xbf16> to vector<128x128xbf16>
    %c6 = arith.constant 6 : index
    %c0_34 = arith.constant 0 : index
    %81 = vector.load %arg3[%c6, %c0_34] : memref<20x128xf32, #tpu.memory_space<vmem>>, vector<1x128xf32>
    %82 = arith.truncf %78 : vector<8x128xf32> to vector<8x128xbf16>
    %cst_35 = arith.constant dense<0.000000e+00> : vector<8x128xf32>
    %83 = tpu.matmul %82, %80, %cst_35 {dimension_numbers = #tpu.dot_dimension_numbers<[1], [0], [0], [1], [0, 0, 1, 1], [], []>} : vector<8x128xbf16>, vector<128x128xbf16>, vector<8x128xf32> -> vector<8x128xf32>
    %84 = vector.broadcast %81 : vector<1x128xf32> to vector<8x128xf32>
    %85 = arith.addf %83, %84 : vector<8x128xf32>
    %c3_36 = arith.constant 3 : index
    %c0_37 = arith.constant 0 : index
    %c0_38 = arith.constant 0 : index
    %86 = vector.load %arg2[%c3_36, %c0_37, %c0_38] : memref<8x128x128xbf16, #tpu.memory_space<vmem>>, vector<1x128x128xbf16>
    %87 = vector.shape_cast %86 : vector<1x128x128xbf16> to vector<128x128xbf16>
    %c7 = arith.constant 7 : index
    %c0_39 = arith.constant 0 : index
    %88 = vector.load %arg3[%c7, %c0_39] : memref<20x128xf32, #tpu.memory_space<vmem>>, vector<1x128xf32>
    %89 = arith.truncf %85 : vector<8x128xf32> to vector<8x128xbf16>
    %cst_40 = arith.constant dense<0.000000e+00> : vector<8x128xf32>
    %90 = tpu.matmul %89, %87, %cst_40 {dimension_numbers = #tpu.dot_dimension_numbers<[1], [0], [0], [1], [0, 0, 1, 1], [], []>} : vector<8x128xbf16>, vector<128x128xbf16>, vector<8x128xf32> -> vector<8x128xf32>
    %91 = vector.broadcast %88 : vector<1x128xf32> to vector<8x128xf32>
    %92 = arith.addf %90, %91 : vector<8x128xf32>
    %c8 = arith.constant 8 : index
    %c0_41 = arith.constant 0 : index
    %93 = vector.load %arg3[%c8, %c0_41] : memref<20x128xf32, #tpu.memory_space<vmem>>, vector<1x128xf32>
    %c9 = arith.constant 9 : index
    %c0_42 = arith.constant 0 : index
    %94 = vector.load %arg3[%c9, %c0_42] : memref<20x128xf32, #tpu.memory_space<vmem>>, vector<1x128xf32>
    %cst_43 = arith.constant dense<0.000000e+00> : vector<8xf32>
    %95 = vector.multi_reduction <add>, %92, %cst_43 [1] : vector<8x128xf32> to vector<8xf32>
    %96 = vector.shape_cast %95 : vector<8xf32> to vector<8x1xf32>
    %cst_44 = arith.constant 6.250000e-02 : f32
    %97 = vector.broadcast %cst_44 : f32 to vector<8x1xf32>
    %98 = arith.mulf %96, %97 : vector<8x1xf32>
    %99 = tpu.iota {dimensions = array<i32: 1>} : vector<8x128xi32>
    %c16_i32 = arith.constant 16 : i32
    %100 = vector.broadcast %c16_i32 : i32 to vector<8x128xi32>
    %101 = arith.cmpi slt, %99, %100 : vector<8x128xi32>
    %102 = vector.broadcast %98 : vector<8x1xf32> to vector<8x128xf32>
    %103 = arith.subf %92, %102 : vector<8x128xf32>
    %cst_45 = arith.constant 0.000000e+00 : f32
    %104 = vector.broadcast %cst_45 : f32 to vector<8x128xf32>
    %105 = arith.select %101, %103, %104 : vector<8x128xi1>, vector<8x128xf32>
    %106 = arith.mulf %105, %105 : vector<8x128xf32>
    %cst_46 = arith.constant dense<0.000000e+00> : vector<8xf32>
    %107 = vector.multi_reduction <add>, %106, %cst_46 [1] : vector<8x128xf32> to vector<8xf32>
    %108 = vector.shape_cast %107 : vector<8xf32> to vector<8x1xf32>
    %cst_47 = arith.constant 6.250000e-02 : f32
    %109 = vector.broadcast %cst_47 : f32 to vector<8x1xf32>
    %110 = arith.mulf %108, %109 : vector<8x1xf32>
    %cst_48 = arith.constant 9.99999974E-6 : f32
    %111 = vector.broadcast %cst_48 : f32 to vector<8x1xf32>
    %112 = arith.addf %110, %111 : vector<8x1xf32>
    %113 = math.rsqrt %112 : vector<8x1xf32>
    %114 = vector.broadcast %113 : vector<8x1xf32> to vector<8x128xf32>
    %115 = arith.mulf %105, %114 : vector<8x128xf32>
    %116 = vector.broadcast %93 : vector<1x128xf32> to vector<8x128xf32>
    %117 = arith.mulf %115, %116 : vector<8x128xf32>
    %118 = vector.broadcast %94 : vector<1x128xf32> to vector<8x128xf32>
    %119 = arith.addf %117, %118 : vector<8x128xf32>
    %c4_49 = arith.constant 4 : index
    %c0_50 = arith.constant 0 : index
    %c0_51 = arith.constant 0 : index
    %120 = vector.load %arg2[%c4_49, %c0_50, %c0_51] : memref<8x128x128xbf16, #tpu.memory_space<vmem>>, vector<1x128x128xbf16>
    %121 = vector.shape_cast %120 : vector<1x128x128xbf16> to vector<128x128xbf16>
    %c10 = arith.constant 10 : index
    %c0_52 = arith.constant 0 : index
    %122 = vector.load %arg3[%c10, %c0_52] : memref<20x128xf32, #tpu.memory_space<vmem>>, vector<1x128xf32>
    %123 = arith.truncf %119 : vector<8x128xf32> to vector<8x128xbf16>
    %cst_53 = arith.constant dense<0.000000e+00> : vector<8x128xf32>
    %124 = tpu.matmul %123, %121, %cst_53 {dimension_numbers = #tpu.dot_dimension_numbers<[1], [0], [0], [1], [0, 0, 1, 1], [], []>} : vector<8x128xbf16>, vector<128x128xbf16>, vector<8x128xf32> -> vector<8x128xf32>
    %125 = vector.broadcast %122 : vector<1x128xf32> to vector<8x128xf32>
    %126 = arith.addf %124, %125 : vector<8x128xf32>
    %c11 = arith.constant 11 : index
    %c0_54 = arith.constant 0 : index
    %127 = vector.load %arg3[%c11, %c0_54] : memref<20x128xf32, #tpu.memory_space<vmem>>, vector<1x128xf32>
    %c12 = arith.constant 12 : index
    %c0_55 = arith.constant 0 : index
    %128 = vector.load %arg3[%c12, %c0_55] : memref<20x128xf32, #tpu.memory_space<vmem>>, vector<1x128xf32>
    %cst_56 = arith.constant dense<0.000000e+00> : vector<8xf32>
    %129 = vector.multi_reduction <add>, %126, %cst_56 [1] : vector<8x128xf32> to vector<8xf32>
    %130 = vector.shape_cast %129 : vector<8xf32> to vector<8x1xf32>
    %cst_57 = arith.constant 6.250000e-02 : f32
    %131 = vector.broadcast %cst_57 : f32 to vector<8x1xf32>
    %132 = arith.mulf %130, %131 : vector<8x1xf32>
    %133 = tpu.iota {dimensions = array<i32: 1>} : vector<8x128xi32>
    %c16_i32_58 = arith.constant 16 : i32
    %134 = vector.broadcast %c16_i32_58 : i32 to vector<8x128xi32>
    %135 = arith.cmpi slt, %133, %134 : vector<8x128xi32>
    %136 = vector.broadcast %132 : vector<8x1xf32> to vector<8x128xf32>
    %137 = arith.subf %126, %136 : vector<8x128xf32>
    %cst_59 = arith.constant 0.000000e+00 : f32
    %138 = vector.broadcast %cst_59 : f32 to vector<8x128xf32>
    %139 = arith.select %135, %137, %138 : vector<8x128xi1>, vector<8x128xf32>
    %140 = arith.mulf %139, %139 : vector<8x128xf32>
    %cst_60 = arith.constant dense<0.000000e+00> : vector<8xf32>
    %141 = vector.multi_reduction <add>, %140, %cst_60 [1] : vector<8x128xf32> to vector<8xf32>
    %142 = vector.shape_cast %141 : vector<8xf32> to vector<8x1xf32>
    %cst_61 = arith.constant 6.250000e-02 : f32
    %143 = vector.broadcast %cst_61 : f32 to vector<8x1xf32>
    %144 = arith.mulf %142, %143 : vector<8x1xf32>
    %cst_62 = arith.constant 9.99999974E-6 : f32
    %145 = vector.broadcast %cst_62 : f32 to vector<8x1xf32>
    %146 = arith.addf %144, %145 : vector<8x1xf32>
    %147 = math.rsqrt %146 : vector<8x1xf32>
    %148 = vector.broadcast %147 : vector<8x1xf32> to vector<8x128xf32>
    %149 = arith.mulf %139, %148 : vector<8x128xf32>
    %150 = vector.broadcast %127 : vector<1x128xf32> to vector<8x128xf32>
    %151 = arith.mulf %149, %150 : vector<8x128xf32>
    %152 = vector.broadcast %128 : vector<1x128xf32> to vector<8x128xf32>
    %153 = arith.addf %151, %152 : vector<8x128xf32>
    %c5_63 = arith.constant 5 : index
    %c0_64 = arith.constant 0 : index
    %c0_65 = arith.constant 0 : index
    %154 = vector.load %arg2[%c5_63, %c0_64, %c0_65] : memref<8x128x128xbf16, #tpu.memory_space<vmem>>, vector<1x128x128xbf16>
    %155 = vector.shape_cast %154 : vector<1x128x128xbf16> to vector<128x128xbf16>
    %c13 = arith.constant 13 : index
    %c0_66 = arith.constant 0 : index
    %156 = vector.load %arg3[%c13, %c0_66] : memref<20x128xf32, #tpu.memory_space<vmem>>, vector<1x128xf32>
    %157 = arith.truncf %153 : vector<8x128xf32> to vector<8x128xbf16>
    %cst_67 = arith.constant dense<0.000000e+00> : vector<8x128xf32>
    %158 = tpu.matmul %157, %155, %cst_67 {dimension_numbers = #tpu.dot_dimension_numbers<[1], [0], [0], [1], [0, 0, 1, 1], [], []>} : vector<8x128xbf16>, vector<128x128xbf16>, vector<8x128xf32> -> vector<8x128xf32>
    %159 = vector.broadcast %156 : vector<1x128xf32> to vector<8x128xf32>
    %160 = arith.addf %158, %159 : vector<8x128xf32>
    %c14 = arith.constant 14 : index
    %c0_68 = arith.constant 0 : index
    %161 = vector.load %arg3[%c14, %c0_68] : memref<20x128xf32, #tpu.memory_space<vmem>>, vector<1x128xf32>
    %c15 = arith.constant 15 : index
    %c0_69 = arith.constant 0 : index
    %162 = vector.load %arg3[%c15, %c0_69] : memref<20x128xf32, #tpu.memory_space<vmem>>, vector<1x128xf32>
    %cst_70 = arith.constant dense<0.000000e+00> : vector<8xf32>
    %163 = vector.multi_reduction <add>, %160, %cst_70 [1] : vector<8x128xf32> to vector<8xf32>
    %164 = vector.shape_cast %163 : vector<8xf32> to vector<8x1xf32>
    %cst_71 = arith.constant 0.020833334 : f32
    %165 = vector.broadcast %cst_71 : f32 to vector<8x1xf32>
    %166 = arith.mulf %164, %165 : vector<8x1xf32>
    %167 = tpu.iota {dimensions = array<i32: 1>} : vector<8x128xi32>
    %c48_i32_72 = arith.constant 48 : i32
    %168 = vector.broadcast %c48_i32_72 : i32 to vector<8x128xi32>
    %169 = arith.cmpi slt, %167, %168 : vector<8x128xi32>
    %170 = vector.broadcast %166 : vector<8x1xf32> to vector<8x128xf32>
    %171 = arith.subf %160, %170 : vector<8x128xf32>
    %cst_73 = arith.constant 0.000000e+00 : f32
    %172 = vector.broadcast %cst_73 : f32 to vector<8x128xf32>
    %173 = arith.select %169, %171, %172 : vector<8x128xi1>, vector<8x128xf32>
    %174 = arith.mulf %173, %173 : vector<8x128xf32>
    %cst_74 = arith.constant dense<0.000000e+00> : vector<8xf32>
    %175 = vector.multi_reduction <add>, %174, %cst_74 [1] : vector<8x128xf32> to vector<8xf32>
    %176 = vector.shape_cast %175 : vector<8xf32> to vector<8x1xf32>
    %cst_75 = arith.constant 0.020833334 : f32
    %177 = vector.broadcast %cst_75 : f32 to vector<8x1xf32>
    %178 = arith.mulf %176, %177 : vector<8x1xf32>
    %cst_76 = arith.constant 9.99999974E-6 : f32
    %179 = vector.broadcast %cst_76 : f32 to vector<8x1xf32>
    %180 = arith.addf %178, %179 : vector<8x1xf32>
    %181 = math.rsqrt %180 : vector<8x1xf32>
    %182 = vector.broadcast %181 : vector<8x1xf32> to vector<8x128xf32>
    %183 = arith.mulf %173, %182 : vector<8x128xf32>
    %184 = vector.broadcast %161 : vector<1x128xf32> to vector<8x128xf32>
    %185 = arith.mulf %183, %184 : vector<8x128xf32>
    %186 = vector.broadcast %162 : vector<1x128xf32> to vector<8x128xf32>
    %187 = arith.addf %185, %186 : vector<8x128xf32>
    %cst_77 = arith.constant 0.000000e+00 : f32
    %188 = vector.broadcast %cst_77 : f32 to vector<8x128xf32>
    %189 = arith.cmpf oge, %187, %188 : vector<8x128xf32>
    %cst_78 = arith.constant 1.000000e-01 : f32
    %190 = vector.broadcast %cst_78 : f32 to vector<8x128xf32>
    %191 = arith.mulf %190, %187 : vector<8x128xf32>
    %192 = arith.select %189, %187, %191 : vector<8x128xi1>, vector<8x128xf32>
    %c6_79 = arith.constant 6 : index
    %c0_80 = arith.constant 0 : index
    %c0_81 = arith.constant 0 : index
    %193 = vector.load %arg2[%c6_79, %c0_80, %c0_81] : memref<8x128x128xbf16, #tpu.memory_space<vmem>>, vector<1x128x128xbf16>
    %194 = vector.shape_cast %193 : vector<1x128x128xbf16> to vector<128x128xbf16>
    %c16 = arith.constant 16 : index
    %c0_82 = arith.constant 0 : index
    %195 = vector.load %arg3[%c16, %c0_82] : memref<20x128xf32, #tpu.memory_space<vmem>>, vector<1x128xf32>
    %196 = arith.truncf %192 : vector<8x128xf32> to vector<8x128xbf16>
    %cst_83 = arith.constant dense<0.000000e+00> : vector<8x128xf32>
    %197 = tpu.matmul %196, %194, %cst_83 {dimension_numbers = #tpu.dot_dimension_numbers<[1], [0], [0], [1], [0, 0, 1, 1], [], []>} : vector<8x128xbf16>, vector<128x128xbf16>, vector<8x128xf32> -> vector<8x128xf32>
    %198 = vector.broadcast %195 : vector<1x128xf32> to vector<8x128xf32>
    %199 = arith.addf %197, %198 : vector<8x128xf32>
    %c17 = arith.constant 17 : index
    %c0_84 = arith.constant 0 : index
    %200 = vector.load %arg3[%c17, %c0_84] : memref<20x128xf32, #tpu.memory_space<vmem>>, vector<1x128xf32>
    %c18 = arith.constant 18 : index
    %c0_85 = arith.constant 0 : index
    %201 = vector.load %arg3[%c18, %c0_85] : memref<20x128xf32, #tpu.memory_space<vmem>>, vector<1x128xf32>
    %cst_86 = arith.constant dense<0.000000e+00> : vector<8xf32>
    %202 = vector.multi_reduction <add>, %199, %cst_86 [1] : vector<8x128xf32> to vector<8xf32>
    %203 = vector.shape_cast %202 : vector<8xf32> to vector<8x1xf32>
    %cst_87 = arith.constant 1.562500e-02 : f32
    %204 = vector.broadcast %cst_87 : f32 to vector<8x1xf32>
    %205 = arith.mulf %203, %204 : vector<8x1xf32>
    %206 = tpu.iota {dimensions = array<i32: 1>} : vector<8x128xi32>
    %c64_i32_88 = arith.constant 64 : i32
    %207 = vector.broadcast %c64_i32_88 : i32 to vector<8x128xi32>
    %208 = arith.cmpi slt, %206, %207 : vector<8x128xi32>
    %209 = vector.broadcast %205 : vector<8x1xf32> to vector<8x128xf32>
    %210 = arith.subf %199, %209 : vector<8x128xf32>
    %cst_89 = arith.constant 0.000000e+00 : f32
    %211 = vector.broadcast %cst_89 : f32 to vector<8x128xf32>
    %212 = arith.select %208, %210, %211 : vector<8x128xi1>, vector<8x128xf32>
    %213 = arith.mulf %212, %212 : vector<8x128xf32>
    %cst_90 = arith.constant dense<0.000000e+00> : vector<8xf32>
    %214 = vector.multi_reduction <add>, %213, %cst_90 [1] : vector<8x128xf32> to vector<8xf32>
    %215 = vector.shape_cast %214 : vector<8xf32> to vector<8x1xf32>
    %cst_91 = arith.constant 1.562500e-02 : f32
    %216 = vector.broadcast %cst_91 : f32 to vector<8x1xf32>
    %217 = arith.mulf %215, %216 : vector<8x1xf32>
    %cst_92 = arith.constant 9.99999974E-6 : f32
    %218 = vector.broadcast %cst_92 : f32 to vector<8x1xf32>
    %219 = arith.addf %217, %218 : vector<8x1xf32>
    %220 = math.rsqrt %219 : vector<8x1xf32>
    %221 = vector.broadcast %220 : vector<8x1xf32> to vector<8x128xf32>
    %222 = arith.mulf %212, %221 : vector<8x128xf32>
    %223 = vector.broadcast %200 : vector<1x128xf32> to vector<8x128xf32>
    %224 = arith.mulf %222, %223 : vector<8x128xf32>
    %225 = vector.broadcast %201 : vector<1x128xf32> to vector<8x128xf32>
    %226 = arith.addf %224, %225 : vector<8x128xf32>
    %cst_93 = arith.constant 0.000000e+00 : f32
    %227 = vector.broadcast %cst_93 : f32 to vector<8x128xf32>
    %228 = arith.cmpf oge, %226, %227 : vector<8x128xf32>
    %cst_94 = arith.constant 1.000000e-01 : f32
    %229 = vector.broadcast %cst_94 : f32 to vector<8x128xf32>
    %230 = arith.mulf %229, %226 : vector<8x128xf32>
    %231 = arith.select %228, %226, %230 : vector<8x128xi1>, vector<8x128xf32>
    %c7_95 = arith.constant 7 : index
    %c0_96 = arith.constant 0 : index
    %c0_97 = arith.constant 0 : index
    %232 = vector.load %arg2[%c7_95, %c0_96, %c0_97] : memref<8x128x128xbf16, #tpu.memory_space<vmem>>, vector<1x128x128xbf16>
    %233 = vector.shape_cast %232 : vector<1x128x128xbf16> to vector<128x128xbf16>
    %c19 = arith.constant 19 : index
    %c0_98 = arith.constant 0 : index
    %234 = vector.load %arg3[%c19, %c0_98] : memref<20x128xf32, #tpu.memory_space<vmem>>, vector<1x128xf32>
    %235 = arith.truncf %231 : vector<8x128xf32> to vector<8x128xbf16>
    %cst_99 = arith.constant dense<0.000000e+00> : vector<8x128xf32>
    %236 = tpu.matmul %235, %233, %cst_99 {dimension_numbers = #tpu.dot_dimension_numbers<[1], [0], [0], [1], [0, 0, 1, 1], [], []>} : vector<8x128xbf16>, vector<128x128xbf16>, vector<8x128xf32> -> vector<8x128xf32>
    %237 = vector.broadcast %234 : vector<1x128xf32> to vector<8x128xf32>
    %238 = arith.addf %236, %237 : vector<8x128xf32>
    %239 = arith.addf %238, %0 : vector<8x128xf32>
    %c0_100 = arith.constant 0 : index
    %c0_101 = arith.constant 0 : index
    %240 = vector.load %arg4[%c0_100, %c0_101] : memref<8x128xf32, #tpu.memory_space<vmem>>, vector<8x128xf32>
    tpu.vector_store %arg4[%c0_100, %c0_101], %239 {strides = array<i32>} : memref<8x128xf32, #tpu.memory_space<vmem>>, vector<8x128xf32>,
    return
  }
  func.func @transform_0(%arg0: i32) -> (i32, i32) {
    %c0_i32 = arith.constant 0 : i32
    %c0_i32_0 = arith.constant 0 : i32
    return %arg0, %c0_i32 : i32, i32
  }
  func.func @transform_1(%arg0: i32) -> (i32, i32, i32) {
    %c0_i32 = arith.constant 0 : i32
    %c0_i32_0 = arith.constant 0 : i32
    %c0_i32_1 = arith.constant 0 : i32
    %c0_i32_2 = arith.constant 0 : i32
    return %c0_i32, %c0_i32_0, %c0_i32_1 : i32, i32, i32
  }
  func.func @transform_2(%arg0: i32) -> (i32, i32) {
    %c0_i32 = arith.constant 0 : i32
    %c0_i32_0 = arith.constant 0 : i32
    %c0_i32_1 = arith.constant 0 : i32
    return %c0_i32, %c0_i32_0 : i32, i32
  }
  func.func @transform_3(%arg0: i32) -> (i32, i32) {
    %c0_i32 = arith.constant 0 : i32
    %c0_i32_0 = arith.constant 0 : i32
    return %arg0, %c0_i32 : i32, i32
  }
}

</mosaic_0001>

<bundles_post_ra>
// kernel: tpu_custom_call.1
= control target key start
LH: loop header
LB: loop body
LE: loop exit
PB: predicated region body
PF: predicated region fallthrough
CT: control target
= control target key end

     0   :  { %8 = vsyncpa [#allocation3], 0  ;;  %s1431_s0 = inlined_call_operand.hbm [shape: f32[8,128], index: 0, kind: input, shape index: {}]   ;;  %s1432_s1 = inlined_call_operand.hbm [shape: bf16[8,128,128], index: 1, kind: input, shape index: {}]   ;;  %s1433_s2 = inlined_call_operand.hbm [shape: f32[20,128], index: 2, kind: input, shape index: {}]   ;;  %s1434_s3 = inlined_call_operand.hbm [shape: f32[8,128], index: 3, kind: output, shape index: {}]  }
   0x1   :  { %9 = vsyncpa [#allocation6], 0  ;;  %s26_s14 = sshll.u32 %s1432_s1, 4  ;;  %s27_s14 = int_to_ptr.hbm [resolvable:$true] %s26_s14 }
   0x2   :  { %10 = vsyncpa [#allocation4], 0  ;;  %s1369_s15 = smov [#allocation5]   ;;  %s16_s19 = sshll.u32 %s1431_s0, 4  ;;  %s17_s19 = int_to_ptr.hbm [resolvable:$true] %s16_s19 }
   0x3   :  { %s28_s16 = sshll.u32 %s1369_s15, 4  ;;  %s1370_s20 = smov 64   ;;  %s29_s16 = int_to_ptr.vmem [resolvable:$true] %s28_s16 }
   0x4   :  { %s1371_s21 = smov 4   ;;  %s1372_s22 = smov [#allocation2]  }
   0x5   :  { %34 = dma.hbm_to_vmem [thread:$0]  %s27_s14, 8192, %s29_s16, [#allocation6], %s1370_s20, %s1370_s20, %s1371_s21  }
   0x6   :  { %s18_s23 = sshll.u32 %s1372_s22, 4  ;;  %s39_s26 = sshll.u32 %s1433_s2, 4  ;;  %s19_s23 = int_to_ptr.vmem [resolvable:$true] %s18_s23  ;;  %s40_s26 = int_to_ptr.hbm [resolvable:$true] %s39_s26 }
   0x7   :  { %21 = dma.hbm_to_vmem [thread:$0]  %s17_s19, 128, %s19_s23, [#allocation3]  }
   0x8   :  { %s1373_s1 = smov [#allocation7]   ;;  %s1374_s28 = smov 128  }
   0x9   :  { %s41_s27 = sshll.u32 %s1373_s1, 4  ;;  %s1375_s29 = smov 8   ;;  %s42_s27 = int_to_ptr.vmem [resolvable:$true] %s41_s27 }
   0xa   :  { %47 = dma.hbm_to_vmem [thread:$0]  %s40_s26, 384, %s42_s27, [#allocation6], %s1374_s28, %s1374_s28, %s1375_s29  }
   0xb   :  { %1363 = dma.done.wait [#allocation3], 128  }
   0xc   :  { %1364 = vsyncadd [#allocation3], 4294967168 }
   0xd   :  { %1365 = dma.done.wait [#allocation6], 8576  }
   0xe   :  { %1366 = vsyncadd [#allocation6], 4294958720  ;;  %v1170_v0 = vld [vmem:[#allocation5 + $0x38] sm:$0xff]  ;;  %v1169_v1 = vld [vmem:[#allocation5 + $0x30] sm:$0xff]  ;;  %v146_v14 = vlaneseq  ;;  %s1376_s0 = smov [#allocation8]   ;;  %s896_s5 = sshll.u32 %s1434_s3, 4  ;;  %s897_s5 = int_to_ptr.hbm [resolvable:$true] %s896_s5 }
   0xf   :  { %128 = vmatpush.bf16.msra.mxu0 %v1170_v0  ;;  %v1168_v2 = vld [vmem:[#allocation5 + $0x28] sm:$0xff]  ;;  %v1167_v3 = vld [vmem:[#allocation5 + $0x20] sm:$0xff]  ;;  %v1166_v4 = vld [vmem:[#allocation5 + $0x18] sm:$0xff]  ;;  %s894_s2 = sshll.u32 %s1376_s0, 4  ;;  %s895_s2 = int_to_ptr.vmem [resolvable:$true] %s894_s2 }
  0x10   :  { %v1165_v5 = vld [vmem:[#allocation5 + $0x10] sm:$0xff]  ;;  %v1164_v6 = vld [vmem:[#allocation5 + $0x8] sm:$0xff]  ;;  %v1163_v7 = vld [vmem:[#allocation5] sm:$0xff]  ;;  %v1410_v15 = vand.u32 127, %v146_v14 }
  0x11   :  { %v1406_v8 = vld [vmem:[#allocation2] sm:$0xff]  ;;  %v1235_v10 = vld [vmem:[#allocation7] ss:$0 sm:$0xff]  ;;  %v1177_v22 = vld [vmem:[#allocation5 + $0x70] sm:$0xff] }
  0x12   :  { %v78_v9 = vpack.c.bf16 %v1406_v8, %v1406_v8  ;;  %vm148_vm0 = vcmp.lt.s32.totalorder %v1410_v15, 64  ;;  %v1178_v21 = vld [vmem:[#allocation5 + $0x78] sm:$0xff]  ;;  %v1176_v23 = vld [vmem:[#allocation5 + $0x68] sm:$0xff]  ;;  %v1175_v24 = vld [vmem:[#allocation5 + $0x60] sm:$0xff]  ;;  %vm260_vm5 = vcmp.lt.s32.totalorder %v1410_v15, 48  ;;  %vm453_vm10 = vcmp.lt.s32.totalorder %v1410_v15, 16 }
  0x13   :  { %129 = vmatpush.bf16.msra.mxu0 %v1169_v1  ;;  %242 = vmatpush.bf16.msra.mxu1 %v1178_v21  ;;  %v1174_v25 = vld [vmem:[#allocation5 + $0x58] sm:$0xff]  ;;  %v1173_v26 = vld [vmem:[#allocation5 + $0x50] sm:$0xff]  ;;  %v1172_v27 = vld [vmem:[#allocation5 + $0x48] sm:$0xff] }
  0x14   :  { %v1171_v28 = vld [vmem:[#allocation5 + $0x40] sm:$0xff]  ;;  %v1186_v56 = vld [vmem:[#allocation5 + $0xb8] sm:$0xff]  ;;  %v1185_v57 = vld [vmem:[#allocation5 + $0xb0] sm:$0xff] }
  0x15   :  { %v1236_v38 = vld [vmem:[#allocation7 + $0x1] ss:$0 sm:$0xff]  ;;  %v1237_v41 = vld [vmem:[#allocation7 + $0x2] ss:$0 sm:$0xff]  ;;  %v1238_v47 = vld [vmem:[#allocation7 + $0x3] ss:$0 sm:$0xff]  ;;  %354 = vmatpush.bf16.msra.mxu2 %v1186_v56 }
  0x16   :  { %v1184_v58 = vld [vmem:[#allocation5 + $0xa8] sm:$0xff]  ;;  %v1183_v59 = vld [vmem:[#allocation5 + $0xa0] sm:$0xff]  ;;  %v1182_v60 = vld [vmem:[#allocation5 + $0x98] sm:$0xff] }
  0x17   :  { %130 = vmatpush.bf16.msra.mxu0 %v1168_v2  ;;  %243 = vmatpush.bf16.msra.mxu1 %v1177_v22  ;;  %v1181_v61 = vld [vmem:[#allocation5 + $0x90] sm:$0xff]  ;;  %v1180_v62 = vld [vmem:[#allocation5 + $0x88] sm:$0xff]  ;;  %v1179_v63 = vld [vmem:[#allocation5 + $0x80] sm:$0xff] }
  0x18   :  { %v1194_v2 = vld [vmem:[#allocation5 + $0xf8] sm:$0xff]  ;;  %v1188_v21 = vld [vmem:[#allocation5 + $0xc8] sm:$0xff] }
  0x19   :  { %355 = vmatpush.bf16.msra.mxu2 %v1185_v57  ;;  %435 = vmatpush.bf16.msra.mxu3 %v1194_v2  ;;  %v1245_v2 = vld [vmem:[#allocation7 + $0xa] ss:$0 sm:$0xff] }
  0x1b   :  { %131 = vmatpush.bf16.msra.mxu0 %v1167_v3  ;;  %244 = vmatpush.bf16.msra.mxu1 %v1176_v23 }
  0x1d   :  { %356 = vmatpush.bf16.msra.mxu2 %v1184_v58 }
  0x1f   :  { %132 = vmatpush.bf16.msra.mxu0 %v1166_v4  ;;  %245 = vmatpush.bf16.msra.mxu1 %v1175_v24  ;;  %v1193_v4 = vld [vmem:[#allocation5 + $0xf0] sm:$0xff] }
  0x20   :  { %436 = vmatpush.bf16.msra.mxu3 %v1193_v4 }
  0x21   :  { %357 = vmatpush.bf16.msra.mxu2 %v1183_v59  ;;  %v1243_v59 = vld [vmem:[#allocation7 + $0x8] ss:$0 sm:$0xff] }
  0x23   :  { %133 = vmatpush.bf16.msra.mxu0 %v1165_v5  ;;  %246 = vmatpush.bf16.msra.mxu1 %v1174_v25  ;;  %v1192_v5 = vld [vmem:[#allocation5 + $0xe8] sm:$0xff] }
  0x24   :  { %437 = vmatpush.bf16.msra.mxu3 %v1192_v5 }
  0x25   :  { %358 = vmatpush.bf16.msra.mxu2 %v1182_v60 }
  0x27   :  { %134 = vmatpush.bf16.msra.mxu0 %v1164_v6  ;;  %247 = vmatpush.bf16.msra.mxu1 %v1173_v26 }
  0x29   :  { %359 = vmatpush.bf16.msra.mxu2 %v1181_v61 }
  0x2b   :  { %135 = vmatpush.bf16.msra.mxu0 %v1163_v7  ;;  %248 = vmatpush.bf16.msra.mxu1 %v1172_v27  ;;  %v1187_v27 = vld [vmem:[#allocation5 + $0xc0] sm:$0xff] }
  0x2d   :  { %360 = vmatpush.bf16.msra.mxu2 %v1180_v62  ;;  %v1244_v62 = vld [vmem:[#allocation7 + $0x9] ss:$0 sm:$0xff] }
  0x2e   :  { %136 = vmatmul.bf16.vlgmr.msra.gmra.mxu0 %v78_v9  ;;  %v1191_v9 = vld [vmem:[#allocation5 + $0xe0] sm:$0xff] }
  0x2f   :  { %249 = vmatpush.bf16.msra.mxu1 %v1171_v28  ;;  %438 = vmatpush.bf16.msra.mxu3 %v1191_v9  ;;  %v1241_v28 = vld [vmem:[#allocation7 + $0x6] ss:$0 sm:$0xff] }
  0x31   :  { %361 = vmatpush.bf16.msra.mxu2 %v1179_v63 }
  0xab   :  { %v137_v11 = vpop.f32.mrf.mxu0 }
  0xac   :  { %v138_v12 = vadd.f32 %v1235_v10, %v137_v11 }
  0xae   :  { %143 = vadd.xlane.f32.xlu0 %v138_v12 }
  0xb3   :  { %v139_v13 = vpop.f32.mrf.mxu0 }
 0x121   :  { %v144_v16 = vpop.xlane.xlu0 %143 }
 0x122   :  { %v145_v17 = vmul.f32 0.015625, %v144_v16  ;;  %v1189_v16 = vld [vmem:[#allocation5 + $0xd0] sm:$0xff] }
 0x124   :  { %v149_v18 = vsub.f32 %v138_v12, %v145_v17  ;;  %v1190_v12 = vld [vmem:[#allocation5 + $0xd8] sm:$0xff]  ;;  %v1239_v17 = vld [vmem:[#allocation7 + $0x4] ss:$0 sm:$0xff] }
 0x125   :  { %439 = vmatpush.bf16.msra.mxu3 %v1190_v12 }
 0x126   :  { %v150_v19 = vsel %vm148_vm0, %v149_v18, 0.0 }
 0x127   :  { %v151_v20 = vmul.f32 %v150_v19, %v150_v19 }
 0x129   :  { %152 = vadd.xlane.f32.xlu0 %v151_v20  ;;  %v1240_v20 = vld [vmem:[#allocation7 + $0x5] ss:$0 sm:$0xff]  ;;  %440 = vmatpush.bf16.msra.mxu3 %v1189_v16 }
 0x12a   :  { %v1207_v16 = vld [vmem:[#allocation5 + $0x160] sm:$0xff] }
 0x12d   :  { %441 = vmatpush.bf16.msra.mxu3 %v1188_v21 }
 0x131   :  { %442 = vmatpush.bf16.msra.mxu3 %v1187_v27 }
 0x19c   :  { %v153_v29 = vpop.xlane.xlu0 %152 }
 0x19d   :  { %v154_v30 = vmul.f32 0.015625, %v153_v29 }
 0x19f   :  { %v155_v31 = vadd.f32 1e-05, %v154_v30 }
 0x1a1   :  { %1255 = vrsqrt.f32 %v155_v31  ;;  %vm162_vm2 = vweird.f32 %v155_v31 }
 0x1a7   :  { %v1256_v32 = vpop.eup %1255 }
 0x1a8   :  { %v157_v33 = vmul.f32 %v1256_v32, %v155_v31  ;;  %vm163_vm1 = vweird.f32 %v1256_v32 }
 0x1a9   :  { %vm164_vm3 = vmor %vm162_vm2, %vm163_vm1 }
 0x1aa   :  { %v158_v34 = vmul.f32 %v1256_v32, %v157_v33  ;;  %v1242_v33 = vld [vmem:[#allocation7 + $0x7] ss:$0 sm:$0xff] }
 0x1ac   :  { %v159_v35 = vmul.f32 0.5, %v158_v34 }
 0x1ae   :  { %v160_v36 = vsub.f32 1.5, %v159_v35 }
 0x1b0   :  { %v161_v37 = vmul.f32 %v1256_v32, %v160_v36 }
 0x1b2   :  { %v165_v39 = vsel %vm164_vm3, %v1256_v32, %v161_v37  ;;  %v1202_v37 = vld [vmem:[#allocation5 + $0x138] sm:$0xff] }
 0x1b3   :  { %v166_v40 = vmul.f32 %v165_v39, %v150_v19  ;;  %544 = vmatpush.bf16.msrb.mxu0 %v1202_v37  ;;  %v1248_v37 = vld [vmem:[#allocation7 + $0xd] ss:$0 sm:$0xff] }
 0x1b5   :  { %v168_v42 = vmul.f32 %v1236_v38, %v166_v40 }
 0x1b7   :  { %v170_v43 = vadd.f32 %v1237_v41, %v168_v42 }
 0x1b9   :  { %vm171_vm4 = vcmp.ge.f32.partialorder %v170_v43, 0.0  ;;  %v172_v44 = vmul.f32 0.1, %v170_v43 }
 0x1bb   :  { %v173_v45 = vsel %vm171_vm4, %v170_v43, %v172_v44  ;;  %v1201_v43 = vld [vmem:[#allocation5 + $0x130] sm:$0xff]  ;;  %v1200_v44 = vld [vmem:[#allocation5 + $0x128] sm:$0xff] }
 0x1bc   :  { %v192_v46 = vpack.c.bf16 %v173_v45, %v173_v45  ;;  %545 = vmatpush.bf16.msrb.mxu0 %v1201_v43  ;;  %v1199_v45 = vld [vmem:[#allocation5 + $0x120] sm:$0xff] }
 0x1be   :  { %250 = vmatmul.bf16.vlgmr.msra.gmra.mxu1 %v192_v46  ;;  %v1198_v46 = vld [vmem:[#allocation5 + $0x118] sm:$0xff] }
 0x1c0   :  { %546 = vmatpush.bf16.msrb.mxu0 %v1200_v44 }
 0x1c4   :  { %547 = vmatpush.bf16.msrb.mxu0 %v1199_v45 }
 0x1c8   :  { %548 = vmatpush.bf16.msrb.mxu0 %v1198_v46  ;;  %v1218_v46 = vld [vmem:[#allocation5 + $0x1b8] sm:$0xff] }
 0x1c9   :  { %763 = vmatpush.bf16.msrb.mxu2 %v1218_v46 }
 0x23b   :  { %v251_v48 = vpop.f32.mrf.mxu1 }
 0x23c   :  { %v252_v49 = vadd.f32 %v1238_v47, %v251_v48  ;;  %v1197_v47 = vld [vmem:[#allocation5 + $0x110] sm:$0xff]  ;;  %v1196_v48 = vld [vmem:[#allocation5 + $0x108] sm:$0xff] }
 0x23d   :  { %549 = vmatpush.bf16.msrb.mxu0 %v1197_v47  ;;  %v1217_v47 = vld [vmem:[#allocation5 + $0x1b0] sm:$0xff] }
 0x23e   :  { %257 = vadd.xlane.f32.xlu1 %v252_v49  ;;  %764 = vmatpush.bf16.msrb.mxu2 %v1217_v47 }
 0x241   :  { %550 = vmatpush.bf16.msrb.mxu0 %v1196_v48  ;;  %v1216_v48 = vld [vmem:[#allocation5 + $0x1a8] sm:$0xff] }
 0x242   :  { %765 = vmatpush.bf16.msrb.mxu2 %v1216_v48 }
 0x243   :  { %v253_v50 = vpop.f32.mrf.mxu1 }
 0x2b1   :  { %v258_v51 = vpop.xlane.xlu1 %257 }
 0x2b2   :  { %v259_v52 = vmul.f32 0.020833334, %v258_v51 }
 0x2b4   :  { %v261_v53 = vsub.f32 %v252_v49, %v259_v52  ;;  %v1195_v49 = vld [vmem:[#allocation5 + $0x100] sm:$0xff] }
 0x2b5   :  { %551 = vmatpush.bf16.msrb.mxu0 %v1195_v49  ;;  %v1215_v49 = vld [vmem:[#allocation5 + $0x1a0] sm:$0xff] }
 0x2b6   :  { %v262_v54 = vsel %vm260_vm5, %v261_v53, 0.0  ;;  %766 = vmatpush.bf16.msrb.mxu2 %v1215_v49 }
 0x2b7   :  { %v263_v55 = vmul.f32 %v262_v54, %v262_v54 }
 0x2b9   :  { %264 = vadd.xlane.f32.xlu1 %v263_v55 }
 0x32c   :  { %v265_v0 = vpop.xlane.xlu1 %264 }
 0x32d   :  { %v266_v1 = vmul.f32 0.020833334, %v265_v0 }
 0x32f   :  { %v267_v3 = vadd.f32 1e-05, %v266_v1 }
 0x331   :  { %1257 = vrsqrt.f32 %v267_v3  ;;  %vm274_vm7 = vweird.f32 %v267_v3 }
 0x337   :  { %v1258_v6 = vpop.eup %1257 }
 0x338   :  { %v269_v7 = vmul.f32 %v1258_v6, %v267_v3  ;;  %vm275_vm6 = vweird.f32 %v1258_v6 }
 0x339   :  { %vm276_vm8 = vmor %vm274_vm7, %vm275_vm6 }
 0x33a   :  { %v270_v10 = vmul.f32 %v1258_v6, %v269_v7 }
 0x33c   :  { %v271_v11 = vmul.f32 0.5, %v270_v10 }
 0x33e   :  { %v272_v13 = vsub.f32 1.5, %v271_v11 }
 0x340   :  { %v273_v14 = vmul.f32 %v1258_v6, %v272_v13  ;;  %v1209_v13 = vld [vmem:[#allocation5 + $0x170] sm:$0xff] }
 0x342   :  { %v277_v18 = vsel %vm276_vm8, %v1258_v6, %v273_v14  ;;  %v1210_v6 = vld [vmem:[#allocation5 + $0x178] sm:$0xff]  ;;  %v1208_v14 = vld [vmem:[#allocation5 + $0x168] sm:$0xff] }
 0x343   :  { %v278_v19 = vmul.f32 %v277_v18, %v262_v54  ;;  %652 = vmatpush.bf16.msrb.mxu1 %v1210_v6  ;;  %v1205_v18 = vld [vmem:[#allocation5 + $0x150] sm:$0xff] }
 0x345   :  { %v280_v22 = vmul.f32 %v1239_v17, %v278_v19  ;;  %v1206_v17 = vld [vmem:[#allocation5 + $0x158] sm:$0xff]  ;;  %v1204_v19 = vld [vmem:[#allocation5 + $0x148] sm:$0xff] }
 0x347   :  { %v282_v23 = vadd.f32 %v1240_v20, %v280_v22  ;;  %653 = vmatpush.bf16.msrb.mxu1 %v1209_v13  ;;  %v1203_v20 = vld [vmem:[#allocation5 + $0x140] sm:$0xff] }
 0x349   :  { %vm283_vm9 = vcmp.ge.f32.partialorder %v282_v23, 0.0  ;;  %v284_v24 = vmul.f32 0.1, %v282_v23 }
 0x34b   :  { %v285_v25 = vsel %vm283_vm9, %v282_v23, %v284_v24  ;;  %654 = vmatpush.bf16.msrb.mxu1 %v1208_v14 }
 0x34c   :  { %v304_v26 = vpack.c.bf16 %v285_v25, %v285_v25 }
 0x34e   :  { %362 = vmatmul.bf16.vlgmr.msra.gmra.mxu2 %v304_v26 }
 0x34f   :  { %655 = vmatpush.bf16.msrb.mxu1 %v1207_v16 }
 0x353   :  { %656 = vmatpush.bf16.msrb.mxu1 %v1206_v17 }
 0x357   :  { %657 = vmatpush.bf16.msrb.mxu1 %v1205_v18 }
 0x35b   :  { %658 = vmatpush.bf16.msrb.mxu1 %v1204_v19  ;;  %v1226_v19 = vld [vmem:[#allocation5 + $0x1f8] sm:$0xff] }
 0x35c   :  { %874 = vmatpush.bf16.msrb.mxu3 %v1226_v19 }
 0x35f   :  { %659 = vmatpush.bf16.msrb.mxu1 %v1203_v20  ;;  %v1225_v20 = vld [vmem:[#allocation5 + $0x1f0] sm:$0xff] }
 0x360   :  { %875 = vmatpush.bf16.msrb.mxu3 %v1225_v20 }
 0x3d1   :  { %v363_v29 = vpop.f32.mrf.mxu2 }
 0x3d2   :  { %v364_v30 = vadd.f32 %v1241_v28, %v363_v29 }
 0x3d4   :  { %v385_v31 = vpack.c.bf16 %v364_v30, %v364_v30  ;;  %v1246_v30 = vld [vmem:[#allocation7 + $0xb] ss:$0 sm:$0xff] }
 0x3d6   :  { %443 = vmatmul.bf16.vlgmr.msra.gmra.mxu3 %v385_v31 }
 0x3d9   :  { %v365_v32 = vpop.f32.mrf.mxu2 }
 0x459   :  { %v444_v34 = vpop.f32.mrf.mxu3 }
 0x45a   :  { %v445_v35 = vadd.f32 %v1242_v33, %v444_v34  ;;  %v1247_v33 = vld [vmem:[#allocation7 + $0xc] ss:$0 sm:$0xff] }
 0x45c   :  { %450 = vadd.xlane.f32.xlu2 %v445_v35 }
 0x461   :  { %v446_v36 = vpop.f32.mrf.mxu3 }
 0x4cf   :  { %v451_v38 = vpop.xlane.xlu2 %450 }
 0x4d0   :  { %v452_v39 = vmul.f32 0.0625, %v451_v38 }
 0x4d2   :  { %v454_v40 = vsub.f32 %v445_v35, %v452_v39 }
 0x4d4   :  { %v455_v41 = vsel %vm453_vm10, %v454_v40, 0.0 }
 0x4d5   :  { %v456_v42 = vmul.f32 %v455_v41, %v455_v41 }
 0x4d7   :  { %457 = vadd.xlane.f32.xlu2 %v456_v42 }
 0x54a   :  { %v458_v50 = vpop.xlane.xlu2 %457 }
 0x54b   :  { %v459_v51 = vmul.f32 0.0625, %v458_v50  ;;  %v1214_v50 = vld [vmem:[#allocation5 + $0x198] sm:$0xff] }
 0x54c   :  { %767 = vmatpush.bf16.msrb.mxu2 %v1214_v50 }
 0x54d   :  { %v460_v52 = vadd.f32 1e-05, %v459_v51  ;;  %v1213_v51 = vld [vmem:[#allocation5 + $0x190] sm:$0xff] }
 0x54f   :  { %1259 = vrsqrt.f32 %v460_v52  ;;  %vm467_vm12 = vweird.f32 %v460_v52 }
 0x550   :  { %768 = vmatpush.bf16.msrb.mxu2 %v1213_v51 }
 0x555   :  { %v1260_v53 = vpop.eup %1259 }
 0x556   :  { %v462_v54 = vmul.f32 %v1260_v53, %v460_v52  ;;  %vm468_vm11 = vweird.f32 %v1260_v53  ;;  %v1212_v52 = vld [vmem:[#allocation5 + $0x188] sm:$0xff] }
 0x557   :  { %vm469_vm13 = vmor %vm467_vm12, %vm468_vm11  ;;  %769 = vmatpush.bf16.msrb.mxu2 %v1212_v52 }
 0x558   :  { %v463_v55 = vmul.f32 %v1260_v53, %v462_v54 }
 0x55a   :  { %v464_v56 = vmul.f32 0.5, %v463_v55 }
 0x55c   :  { %v465_v57 = vsub.f32 1.5, %v464_v56 }
 0x55e   :  { %v466_v58 = vmul.f32 %v1260_v53, %v465_v57 }
 0x560   :  { %v470_v60 = vsel %vm469_vm13, %v1260_v53, %v466_v58  ;;  %v1211_v53 = vld [vmem:[#allocation5 + $0x180] sm:$0xff] }
 0x561   :  { %v471_v61 = vmul.f32 %v470_v60, %v455_v41  ;;  %770 = vmatpush.bf16.msrb.mxu2 %v1211_v53 }
 0x563   :  { %v473_v63 = vmul.f32 %v1243_v59, %v471_v61 }
 0x565   :  { %v475_v0 = vadd.f32 %v1244_v62, %v473_v63  ;;  %v1249_v63 = vld [vmem:[#allocation7 + $0xe] ss:$0 sm:$0xff] }
 0x567   :  { %v494_v1 = vpack.c.bf16 %v475_v0, %v475_v0 }
 0x569   :  { %552 = vmatmul.bf16.vlgmr.msrb.gmra.mxu0 %v494_v1 }
 0x5e6   :  { %v553_v3 = vpop.f32.mrf.mxu0 }
 0x5e7   :  { %v554_v4 = vadd.f32 %v1245_v2, %v553_v3  ;;  %v1250_v2 = vld [vmem:[#allocation7 + $0xf] ss:$0 sm:$0xff] }
 0x5e9   :  { %559 = vadd.xlane.f32.xlu0 %v554_v4 }
 0x5ee   :  { %v555_v5 = vpop.f32.mrf.mxu0 }
 0x65c   :  { %v560_v7 = vpop.xlane.xlu0 %559 }
 0x65d   :  { %v561_v9 = vmul.f32 0.0625, %v560_v7 }
 0x65f   :  { %v562_v10 = vsub.f32 %v554_v4, %v561_v9  ;;  %v1251_v9 = vld [vmem:[#allocation7 + $0x10] ss:$0 sm:$0xff] }
 0x661   :  { %v563_v11 = vsel %vm453_vm10, %v562_v10, 0.0 }
 0x662   :  { %v564_v12 = vmul.f32 %v563_v11, %v563_v11 }
 0x664   :  { %565 = vadd.xlane.f32.xlu1 %v564_v12 }
 0x6d7   :  { %v566_v21 = vpop.xlane.xlu1 %565 }
 0x6d8   :  { %v567_v22 = vmul.f32 0.0625, %v566_v21  ;;  %v1224_v21 = vld [vmem:[#allocation5 + $0x1e8] sm:$0xff] }
 0x6d9   :  { %876 = vmatpush.bf16.msrb.mxu3 %v1224_v21 }
 0x6da   :  { %v568_v23 = vadd.f32 1e-05, %v567_v22  ;;  %v1223_v22 = vld [vmem:[#allocation5 + $0x1e0] sm:$0xff] }
 0x6dc   :  { %1261 = vrsqrt.f32 %v568_v23  ;;  %vm575_vm15 = vweird.f32 %v568_v23 }
 0x6dd   :  { %877 = vmatpush.bf16.msrb.mxu3 %v1223_v22 }
 0x6e2   :  { %v1262_v24 = vpop.eup %1261 }
 0x6e3   :  { %v570_v25 = vmul.f32 %v1262_v24, %v568_v23  ;;  %vm576_vm14 = vweird.f32 %v1262_v24  ;;  %v1222_v23 = vld [vmem:[#allocation5 + $0x1d8] sm:$0xff] }
 0x6e4   :  { %vm577_vm1 = vmor %vm575_vm15, %vm576_vm14  ;;  %878 = vmatpush.bf16.msrb.mxu3 %v1222_v23 }
 0x6e5   :  { %v571_v26 = vmul.f32 %v1262_v24, %v570_v25  ;;  %v1220_v25 = vld [vmem:[#allocation5 + $0x1c8] sm:$0xff] }
 0x6e7   :  { %v572_v27 = vmul.f32 0.5, %v571_v26  ;;  %v1219_v26 = vld [vmem:[#allocation5 + $0x1c0] sm:$0xff] }
 0x6e9   :  { %v573_v28 = vsub.f32 1.5, %v572_v27 }
 0x6eb   :  { %v574_v29 = vmul.f32 %v1262_v24, %v573_v28 }
 0x6ed   :  { %v578_v31 = vsel %vm577_vm1, %v1262_v24, %v574_v29  ;;  %v1221_v24 = vld [vmem:[#allocation5 + $0x1d0] sm:$0xff] }
 0x6ee   :  { %v579_v32 = vmul.f32 %v578_v31, %v563_v11  ;;  %879 = vmatpush.bf16.msrb.mxu3 %v1221_v24 }
 0x6f0   :  { %v581_v34 = vmul.f32 %v1246_v30, %v579_v32 }
 0x6f2   :  { %v583_v35 = vadd.f32 %v1247_v33, %v581_v34  ;;  %880 = vmatpush.bf16.msrb.mxu3 %v1220_v25 }
 0x6f4   :  { %v602_v36 = vpack.c.bf16 %v583_v35, %v583_v35  ;;  %v1252_v35 = vld [vmem:[#allocation7 + $0x11] ss:$0 sm:$0xff] }
 0x6f6   :  { %660 = vmatmul.bf16.vlgmr.msrb.gmra.mxu1 %v602_v36  ;;  %881 = vmatpush.bf16.msrb.mxu3 %v1219_v26 }
 0x773   :  { %v661_v38 = vpop.f32.mrf.mxu1 }
 0x774   :  { %v662_v39 = vadd.f32 %v1248_v37, %v661_v38  ;;  %v1253_v38 = vld [vmem:[#allocation7 + $0x12] ss:$0 sm:$0xff] }
 0x776   :  { %667 = vadd.xlane.f32.xlu2 %v662_v39 }
 0x77b   :  { %v663_v40 = vpop.f32.mrf.mxu1 }
 0x7e9   :  { %v668_v41 = vpop.xlane.xlu2 %667 }
 0x7ea   :  { %v669_v42 = vmul.f32 0.020833334, %v668_v41 }
 0x7ec   :  { %v670_v43 = vsub.f32 %v662_v39, %v669_v42 }
 0x7ee   :  { %v671_v44 = vsel %vm260_vm5, %v670_v43, 0.0 }
 0x7ef   :  { %v672_v45 = vmul.f32 %v671_v44, %v671_v44 }
 0x7f1   :  { %673 = vadd.xlane.f32.xlu0 %v672_v45 }
 0x864   :  { %v674_v54 = vpop.xlane.xlu0 %673 }
 0x865   :  { %v675_v55 = vmul.f32 0.020833334, %v674_v54 }
 0x867   :  { %v676_v56 = vadd.f32 1e-05, %v675_v55 }
 0x869   :  { %1263 = vrsqrt.f32 %v676_v56  ;;  %vm683_vm3 = vweird.f32 %v676_v56 }
 0x86f   :  { %v1264_v57 = vpop.eup %1263 }
 0x870   :  { %v678_v58 = vmul.f32 %v1264_v57, %v676_v56  ;;  %vm684_vm2 = vweird.f32 %v1264_v57 }
 0x871   :  { %vm685_vm4 = vmor %vm683_vm3, %vm684_vm2 }
 0x872   :  { %v679_v59 = vmul.f32 %v1264_v57, %v678_v58 }
 0x874   :  { %v680_v60 = vmul.f32 0.5, %v679_v59 }
 0x876   :  { %v681_v61 = vsub.f32 1.5, %v680_v60 }
 0x878   :  { %v682_v62 = vmul.f32 %v1264_v57, %v681_v61 }
 0x87a   :  { %v686_v0 = vsel %vm685_vm4, %v1264_v57, %v682_v62 }
 0x87b   :  { %v687_v1 = vmul.f32 %v686_v0, %v671_v44  ;;  %v1254_v44 = vld [vmem:[#allocation7 + $0x13] ss:$0 sm:$0xff] }
 0x87d   :  { %v689_v3 = vmul.f32 %v1249_v63, %v687_v1 }
 0x87f   :  { %v691_v4 = vadd.f32 %v1250_v2, %v689_v3 }
 0x881   :  { %vm692_vm5 = vcmp.ge.f32.partialorder %v691_v4, 0.0  ;;  %v693_v5 = vmul.f32 0.1, %v691_v4 }
 0x883   :  { %v694_v6 = vsel %vm692_vm5, %v691_v4, %v693_v5 }
 0x884   :  { %v713_v7 = vpack.c.bf16 %v694_v6, %v694_v6 }
 0x886   :  { %771 = vmatmul.bf16.vlgmr.msrb.gmra.mxu2 %v713_v7 }
 0x909   :  { %v772_v10 = vpop.f32.mrf.mxu2 }
 0x90a   :  { %v773_v11 = vadd.f32 %v1251_v9, %v772_v10 }
 0x90c   :  { %778 = vadd.xlane.f32.xlu1 %v773_v11 }
 0x911   :  { %v774_v12 = vpop.f32.mrf.mxu2 }
 0x97f   :  { %v779_v13 = vpop.xlane.xlu1 %778 }
 0x980   :  { %v780_v14 = vmul.f32 0.015625, %v779_v13 }
 0x982   :  { %v781_v16 = vsub.f32 %v773_v11, %v780_v14 }
 0x984   :  { %v782_v17 = vsel %vm148_vm0, %v781_v16, 0.0 }
 0x985   :  { %v783_v18 = vmul.f32 %v782_v17, %v782_v17 }
 0x987   :  { %784 = vadd.xlane.f32.xlu2 %v783_v18 }
 0x9fa   :  { %v785_v15 = vpop.xlane.xlu2 %784 }
 0x9fb   :  { %v786_v27 = vmul.f32 0.015625, %v785_v15 }
 0x9fd   :  { %v787_v28 = vadd.f32 1e-05, %v786_v27 }
 0x9ff   :  { %1265 = vrsqrt.f32 %v787_v28  ;;  %vm794_vm6 = vweird.f32 %v787_v28 }
 0xa05   :  { %v1266_v29 = vpop.eup %1265 }
 0xa06   :  { %v789_v30 = vmul.f32 %v1266_v29, %v787_v28  ;;  %vm795_vm0 = vweird.f32 %v1266_v29 }
 0xa07   :  { %vm796_vm7 = vmor %vm794_vm6, %vm795_vm0 }
 0xa08   :  { %v790_v31 = vmul.f32 %v1266_v29, %v789_v30 }
 0xa0a   :  { %v791_v32 = vmul.f32 0.5, %v790_v31 }
 0xa0c   :  { %v792_v33 = vsub.f32 1.5, %v791_v32 }
 0xa0e   :  { %v793_v34 = vmul.f32 %v1266_v29, %v792_v33 }
 0xa10   :  { %v797_v36 = vsel %vm796_vm7, %v1266_v29, %v793_v34 }
 0xa11   :  { %v798_v37 = vmul.f32 %v797_v36, %v782_v17 }
 0xa13   :  { %v800_v39 = vmul.f32 %v1252_v35, %v798_v37 }
 0xa15   :  { %v802_v40 = vadd.f32 %v1253_v38, %v800_v39 }
 0xa17   :  { %vm803_vm8 = vcmp.ge.f32.partialorder %v802_v40, 0.0  ;;  %v804_v41 = vmul.f32 0.1, %v802_v40 }
 0xa19   :  { %v805_v42 = vsel %vm803_vm8, %v802_v40, %v804_v41 }
 0xa1a   :  { %v824_v43 = vpack.c.bf16 %v805_v42, %v805_v42 }
 0xa1c   :  { %882 = vmatmul.bf16.vlgmr.msrb.gmra.mxu3 %v824_v43 }
 0xa9f   :  { %v883_v45 = vpop.f32.mrf.mxu3 }
 0xaa0   :  { %v884_v46 = vadd.f32 %v1254_v44, %v883_v45 }
 0xaa2   :  { %v887_v47 = vadd.f32 %v884_v46, %v1406_v8 }
 0xaa4   :  { %888 = vst [vmem:[#allocation8] sm:$0xff] %v887_v47 }
 0xaa5   :  { %899 = dma.vmem_to_hbm [thread:$0]  %s895_s2, 128, %s897_s5, [#allocation4]  }
 0xaa7   :  { %v885_v48 = vpop.f32.mrf.mxu3 }
 0xaa8   :  { %1367 = dma.done.wait [#allocation4], 128  }
 0xaa9   :  { %1368 = vsyncadd [#allocation4], 4294967168 }
 0xaaa   :  { %904 = vsyncpa [#allocation3], 1 }
 0xaab   :  { %905 = vsyncpa [#allocation6], 1 }
 0xaac   :  { %906 = vsyncpa [#allocation4], 1 }

</bundles_post_ra>
